<compile_context>
chip_gen: v5e
topology: v5e:2x2
jax: 0.10.0
libtpu: 0.0.40
codegen_flags: <defaults>
</compile_context>

<pallas_src>
import math

import jax
import jax.numpy as jnp
from jax.experimental import pallas as pl
from jax.experimental.pallas import tpu as pltpu


def _round_up(x, m):
    return ((x + m - 1) // m) * m


def _block_diag(w, p):
    """Block-diagonal stack of `p` copies of a 2-D matrix (tiny, host-side)."""
    if p == 1:
        return w
    r, c = w.shape
    out = jnp.zeros((p * r, p * c), w.dtype)
    for i in range(p):
        out = out.at[i * r:(i + 1) * r, i * c:(i + 1) * c].set(w)
    return out


def mlp_eval_kernel(x_ref, w0_ref, w1_ref, o_ref):
    # Weights are small and fully resident; cast the streamed rows to the
    # compute dtype in-kernel (keeps the HBM stream in the input dtype).
    w0 = w0_ref[...]
    x = x_ref[...].astype(w0.dtype)
    # First projection: (tm_p, P*E) @ (P*E, P*E) on the MXU, f32 accumulation.
    h = jnp.dot(x, w0, preferred_element_type=jnp.float32)
    h = jnp.maximum(h, 0.0)                                  # ReLU (VPU, f32)
    # Second projection: (tm_p, P*E) @ (P*E, P) on the MXU, f32 throughout.
    logits = jnp.dot(h, w1_ref[...], preferred_element_type=jnp.float32)
    o_ref[...] = jax.nn.sigmoid(logits).astype(o_ref.dtype)


def mlp_evaluation(inputs, W0, W1, *, tm=8192, compute_dtype=jnp.bfloat16):
    """inputs: (N, E), W0: (E, E), W1: (E, 1) -> (N, 1) f32.

    tm:            requested row tile (logical rows); converted into a packed
                    tile and rebalanced so padding waste stays < 8*P rows/step.
    compute_dtype: dtype the first matmul runs in on the MXU (bf16 default;
                    pass jnp.float32 for full precision, None = input dtype).
                    The cast happens inside the kernel, not as an extra HBM
                    pass in the wrapper.
    """
    N, E = inputs.shape
    assert W0.shape == (E, E) and W1.shape == (E, 1)

    if compute_dtype is None:
        compute_dtype = inputs.dtype

    # Lane-packing factor: P logical rows per 128-lane vreg row when E | 128.
    P = 128 // E if (E < 128 and 128 % E == 0) else 1
    PE = P * E

    # --- tile / grid selection (padding decoupled from the tile) -------------
    tm_p_req = max(8, (max(tm, 8 * P) // P // 8) * 8)   # requested packed tile
    np_raw = pl.cdiv(N, P)                              # packed rows needed
    if np_raw <= tm_p_req:
        nblocks = 1
        tm_p = np_raw                  # single block == full extent (always legal)
    else:
        nblocks = pl.cdiv(np_raw, tm_p_req)             # step count from request
        tm_p = _round_up(pl.cdiv(np_raw, nblocks), 8)   # balanced, mult-of-8 tile
    np_pad = nblocks * tm_p
    n_pad = np_pad * P

    # --- operand prep ---------------------------------------------------------
    x = inputs
    if n_pad != N:
        # <= 8*P logical rows of padding per grid step; padded rows give
        # sigmoid(0)=0.5 and are sliced off below.  No copy when N is aligned.
        x = jnp.pad(x, ((0, n_pad - N), (0, 0)))
    x = x.reshape(np_pad, PE)                            # free row-major relayout
    w0_blk = _block_diag(W0, P).astype(compute_dtype)    # (PE, PE)
    w1_blk = _block_diag(W1, P).astype(jnp.float32)      # (PE, P), kept f32

    out = pl.pallas_call(
        mlp_eval_kernel,
        out_shape=jax.ShapeDtypeStruct((np_pad, P), jnp.float32),
        grid_spec=pltpu.PrefetchScalarGridSpec(
            num_scalar_prefetch=0,
            grid=(nblocks,),
            in_specs=[
                # Packed row tile of the batch; weights fully resident.
                pl.BlockSpec((tm_p, PE), lambda i: (i, 0)),
                pl.BlockSpec((PE, PE), lambda i: (0, 0)),
                pl.BlockSpec((PE, P), lambda i: (0, 0)),
            ],
            out_specs=pl.BlockSpec((tm_p, P), lambda i: (i, 0)),
        ),
        compiler_params=pltpu.CompilerParams(
            # Megacore sharding on v7x; serial (and harmless) on v5e/v6e.
            dimension_semantics=("parallel",),
            # Headroom for user-requested larger tm; default tiles use a few MiB.
            vmem_limit_bytes=32 << 20,
        ),
    )(x, w0_blk, w1_blk)

    # (np_pad, P) row-major == (n_pad, 1) in logical row order.
    return out.reshape(n_pad, 1)[:N]


def xavier_uniform(key, shape, dtype=jnp.float32):
    # Matches torch.nn.init.xavier_uniform_ for 2-D weights: U(-a, a),
    # a = sqrt(6 / (fan_in + fan_out)).
    fan_in, fan_out = shape[0], shape[1]
    a = math.sqrt(6.0 / (fan_in + fan_out))
    return jax.random.uniform(key, shape, dtype=dtype, minval=-a, maxval=a)


if __name__ == "__main__":
    emb_size = 32
    batch = 16

    key = jax.random.PRNGKey(0)
    k_x, k_w0, k_w1 = jax.random.split(key, 3)

    inputs = jax.random.normal(k_x, (batch, emb_size), dtype=jnp.float32)
    W0 = xavier_uniform(k_w0, (emb_size, emb_size))
    W1 = xavier_uniform(k_w1, (emb_size, 1))

    ref = jax.nn.sigmoid(jnp.maximum(inputs @ W0, 0.0) @ W1)

    # Default path: lane-packed (P=4), bf16 compute, f32 accumulation.
    out_bf16 = jax.block_until_ready(mlp_evaluation(inputs, W0, W1))
    assert out_bf16.shape == (batch, 1)
    assert jnp.allclose(out_bf16, ref, atol=2e-2, rtol=2e-2)

    # Full-precision compute path.
    out_f32 = jax.block_until_ready(
        mlp_evaluation(inputs, W0, W1, compute_dtype=jnp.float32))
    assert out_f32.shape == (batch, 1)
    assert jnp.allclose(out_f32, ref, atol=2e-3, rtol=2e-3)

    # Ragged batch + multi-step grid: N=300 -> pad to 320 logical rows,
    # 2 balanced grid steps of 40 packed rows each (padding < 32 rows).
    batch2 = 300
    inputs2 = jax.random.normal(jax.random.PRNGKey(1), (batch2, emb_size),
                                dtype=jnp.float32)
    ref2 = jax.nn.sigmoid(jnp.maximum(inputs2 @ W0, 0.0) @ W1)
    out2 = jax.block_until_ready(mlp_evaluation(inputs2, W0, W1, tm=256))
    assert out2.shape == (batch2, 1)
    assert jnp.allclose(out2, ref2, atol=2e-2, rtol=2e-2)

    print("KERNEL_OK")
</pallas_src>

<mosaic_0001>
module attributes {stable_mosaic.version = 11 : i64} {
  func.func @mlp_eval_kernel(%arg0: i32, %arg1: memref<4x128xf32, #tpu.memory_space<vmem>>, %arg2: memref<128x128xbf16, #tpu.memory_space<vmem>>, %arg3: memref<128x4xf32, #tpu.memory_space<vmem>>, %arg4: memref<4x4xf32, #tpu.memory_space<vmem>>) attributes {dimension_semantics = [#tpu.dimension_semantics<parallel>], iteration_bounds = array<i64: 1>, scalar_prefetch = 0 : i64, scratch_operands = 0 : i64, tpu.core_type = #tpu.core_type<tc>, window_params = [{transform_indices = @transform_0, window_bounds = array<i64: 4, 128>}, {pipeline_mode = #tpu.pipeline_mode<synchronous>, transform_indices = @transform_1, window_bounds = array<i64: 128, 128>}, {pipeline_mode = #tpu.pipeline_mode<synchronous>, transform_indices = @transform_2, window_bounds = array<i64: 128, 4>}, {transform_indices = @transform_3, window_bounds = array<i64: 4, 4>}]} {
    %c0 = arith.constant 0 : index
    %c0_0 = arith.constant 0 : index
    %0 = vector.load %arg2[%c0, %c0_0] : memref<128x128xbf16, #tpu.memory_space<vmem>>, vector<128x128xbf16>
    %c0_1 = arith.constant 0 : index
    %c0_2 = arith.constant 0 : index
    %1 = vector.load %arg1[%c0_1, %c0_2] : memref<4x128xf32, #tpu.memory_space<vmem>>, vector<4x128xf32>
    %2 = arith.truncf %1 : vector<4x128xf32> to vector<4x128xbf16>
    %cst = arith.constant dense<0.000000e+00> : vector<4x128xf32>
    %3 = tpu.matmul %2, %0, %cst {dimension_numbers = #tpu.dot_dimension_numbers<[1], [0], [0], [1], [0, 0, 1, 1], [], []>} : vector<4x128xbf16>, vector<128x128xbf16>, vector<4x128xf32> -> vector<4x128xf32>
    %cst_3 = arith.constant 0.000000e+00 : f32
    %4 = vector.broadcast %cst_3 : f32 to vector<4x128xf32>
    %5 = arith.maximumf %3, %4 : vector<4x128xf32>
    %c0_4 = arith.constant 0 : index
    %c0_5 = arith.constant 0 : index
    %6 = vector.load %arg3[%c0_4, %c0_5] : memref<128x4xf32, #tpu.memory_space<vmem>>, vector<128x4xf32>
    %cst_6 = arith.constant dense<0.000000e+00> : vector<4x4xf32>
    %7 = tpu.matmul %5, %6, %cst_6 {dimension_numbers = #tpu.dot_dimension_numbers<[1], [0], [0], [1], [0, 0, 1, 1], [], []>} : vector<4x128xf32>, vector<128x4xf32>, vector<4x4xf32> -> vector<4x4xf32>
    %8 = arith.negf %7 : vector<4x4xf32>
    %9 = math.exp %8 : vector<4x4xf32>
    %cst_7 = arith.constant 1.000000e+00 : f32
    %10 = vector.broadcast %cst_7 : f32 to vector<4x4xf32>
    %11 = arith.addf %10, %9 : vector<4x4xf32>
    %12 = arith.divf %10, %11 : vector<4x4xf32>
    %c0_8 = arith.constant 0 : index
    %c0_9 = arith.constant 0 : index
    %13 = vector.load %arg4[%c0_8, %c0_9] : memref<4x4xf32, #tpu.memory_space<vmem>>, vector<4x4xf32>
    tpu.vector_store %arg4[%c0_8, %c0_9], %12 {strides = array<i32>} : memref<4x4xf32, #tpu.memory_space<vmem>>, vector<4x4xf32>,
    return
  }
  func.func @transform_0(%arg0: i32) -> (i32, i32) {
    %c0_i32 = arith.constant 0 : i32
    %c0_i32_0 = arith.constant 0 : i32
    return %arg0, %c0_i32 : i32, i32
  }
  func.func @transform_1(%arg0: i32) -> (i32, i32) {
    %c0_i32 = arith.constant 0 : i32
    %c0_i32_0 = arith.constant 0 : i32
    %c0_i32_1 = arith.constant 0 : i32
    return %c0_i32, %c0_i32_0 : i32, i32
  }
  func.func @transform_2(%arg0: i32) -> (i32, i32) {
    %c0_i32 = arith.constant 0 : i32
    %c0_i32_0 = arith.constant 0 : i32
    %c0_i32_1 = arith.constant 0 : i32
    return %c0_i32, %c0_i32_0 : i32, i32
  }
  func.func @transform_3(%arg0: i32) -> (i32, i32) {
    %c0_i32 = arith.constant 0 : i32
    %c0_i32_0 = arith.constant 0 : i32
    return %arg0, %c0_i32 : i32, i32
  }
}

</mosaic_0001>

<bundles_post_ra>
// kernel: tpu_custom_call.1
= control target key start
LH: loop header
LB: loop body
LE: loop exit
PB: predicated region body
PF: predicated region fallthrough
CT: control target
= control target key end

     0   :  { %s339_s0 = inlined_call_operand.vmem [shape: f32[4,128], index: 0, kind: input, shape index: {}]   ;;  %s340_s1 = inlined_call_operand.vmem [shape: bf16[128,128], index: 1, kind: input, shape index: {}]   ;;  %s341_s2 = inlined_call_operand.vmem [shape: f32[128,4], index: 2, kind: input, shape index: {}]   ;;  %s342_s3 = inlined_call_operand.hbm [shape: f32[4,4], index: 3, kind: output, shape index: {}]  }
   0x1   :  { %v208_v0 = vld [vmem:[%s340_s1 + $0x38] sm:$0xff]  ;;  %v207_v1 = vld [vmem:[%s340_s1 + $0x30] sm:$0xff]  ;;  %v108_v4 = vld [vmem:[%s341_s2 + $0x68] sm:$0xff] }
   0x2   :  { %81 = vmatpush.bf16.msra.mxu0 %v208_v0  ;;  %v110_v2 = vld [vmem:[%s341_s2 + $0x78] sm:$0xff]  ;;  %v109_v3 = vld [vmem:[%s341_s2 + $0x70] sm:$0xff]  ;;  %v206_v5 = vld [vmem:[%s340_s1 + $0x28] sm:$0xff] }
   0x3   :  { %111 = vmatpush.msra.mxu1 %v110_v2  ;;  %v107_v6 = vld [vmem:[%s341_s2 + $0x60] sm:$0xff] }
   0x5   :  { %112 = vmatpush.msra.mxu1 %v109_v3 }
   0x6   :  { %82 = vmatpush.bf16.msra.mxu0 %v207_v1 }
   0x7   :  { %8 = vsyncpa [#allocation3], 0  ;;  %113 = vmatpush.msra.mxu1 %v108_v4  ;;  %v106_v7 = vld [vmem:[%s341_s2 + $0x58] sm:$0xff]  ;;  %v205_v8 = vld [vmem:[%s340_s1 + $0x20] sm:$0xff]  ;;  %s159_s9 = sshll.u32 %s342_s3, 4  ;;  %vm150_vm3 = vcmask 27648   ;;  %s160_s9 = int_to_ptr.hbm [resolvable:$true] %s159_s9 }
   0x8   :  { %v105_v9 = vld [vmem:[%s341_s2 + $0x50] sm:$0xff]  ;;  %v104_v10 = vld [vmem:[%s341_s2 + $0x48] sm:$0xff]  ;;  %v204_v11 = vld [vmem:[%s340_s1 + $0x18] sm:$0xff] }
   0x9   :  { %114 = vmatpush.msra.mxu1 %v107_v6  ;;  %v103_v12 = vld [vmem:[%s341_s2 + $0x40] sm:$0xff]  ;;  %v102_v13 = vld [vmem:[%s341_s2 + $0x38] sm:$0xff]  ;;  %v203_v14 = vld [vmem:[%s340_s1 + $0x10] sm:$0xff] }
   0xa   :  { %83 = vmatpush.bf16.msra.mxu0 %v206_v5  ;;  %v101_v15 = vld [vmem:[%s341_s2 + $0x30] sm:$0xff]  ;;  %v100_v16 = vld [vmem:[%s341_s2 + $0x28] sm:$0xff]  ;;  %v99_v18 = vld [vmem:[%s341_s2 + $0x20] sm:$0xff] }
   0xb   :  { %115 = vmatpush.msra.mxu1 %v106_v7  ;;  %v202_v17 = vld [vmem:[%s340_s1 + $0x8] sm:$0xff]  ;;  %v98_v19 = vld [vmem:[%s341_s2 + $0x18] sm:$0xff]  ;;  %v201_v20 = vld [vmem:[%s340_s1] sm:$0xff] }
   0xc   :  { %v31_v21 = vld [vmem:[%s339_s0] sm:$0xf]  ;;  %v97_v22 = vld [vmem:[%s341_s2 + $0x10] sm:$0xff]  ;;  %v96_v24 = vld [vmem:[%s341_s2 + $0x8] sm:$0xff]  ;;  %s240_s0 = smov [#allocation2]  }
   0xd   :  { %116 = vmatpush.msra.mxu1 %v105_v9  ;;  %v32_v23 = vpack.c.bf16 %v31_v21, %v31_v21  ;;  %v95_v25 = vld [vmem:[%s341_s2] sm:$0xff]  ;;  %s157_s2 = sshll.u32 %s240_s0, 4  ;;  %s158_s2 = int_to_ptr.vmem [resolvable:$true] %s157_s2 }
   0xe   :  { %84 = vmatpush.bf16.msra.mxu0 %v205_v8 }
   0xf   :  { %117 = vmatpush.msra.mxu1 %v104_v10 }
  0x11   :  { %118 = vmatpush.msra.mxu1 %v103_v12 }
  0x12   :  { %85 = vmatpush.bf16.msra.mxu0 %v204_v11 }
  0x13   :  { %119 = vmatpush.msra.mxu1 %v102_v13 }
  0x15   :  { %120 = vmatpush.msra.mxu1 %v101_v15 }
  0x16   :  { %86 = vmatpush.bf16.msra.mxu0 %v203_v14 }
  0x17   :  { %121 = vmatpush.msra.mxu1 %v100_v16 }
  0x19   :  { %122 = vmatpush.msra.mxu1 %v99_v18 }
  0x1a   :  { %87 = vmatpush.bf16.msra.mxu0 %v202_v17 }
  0x1b   :  { %123 = vmatpush.msra.mxu1 %v98_v19 }
  0x1d   :  { %124 = vmatpush.msra.mxu1 %v97_v22 }
  0x1e   :  { %88 = vmatpush.bf16.msra.mxu0 %v201_v20 }
  0x1f   :  { %125 = vmatpush.msra.mxu1 %v96_v24 }
  0x21   :  { %89 = vmatmul.bf16.vlgmr.msra.gmra.mxu0 %v32_v23  ;;  %126 = vmatpush.msra.mxu1 %v95_v25 }
  0x9e   :  { %v90_v26 = vpop.f32.mrf.mxu0 }
  0x9f   :  { %v94_v27 = vmax.f32 %v90_v26, 0.0 }
  0xa1   :  { %127 = vmatmul.f32.vlgmr.msra.gmra.mxu1 %v94_v27 }
  0xa6   :  { %v92_v28 = vpop.f32.mrf.mxu0 }
 0x11e   :  { %v128_v29 = vpop.f32.mrf.mxu1 }
 0x11f   :  { %v200_v30 = vmul.f32 -1.442695, %v128_v29 }
 0x121   :  { %210 = vpow2.f32 %v200_v30 }
 0x127   :  { %v211_v31 = vpop.eup %210 }
 0x128   :  { %v134_v32 = vadd.f32 1.0, %v211_v31 }
 0x12a   :  { %212 = vrcp.f32 %v134_v32  ;;  %v146_v36 = vand.u32 2147483648, %v134_v32  ;;  %v144_v38 = vand.u32 2147483647, %v134_v32  ;;  %vm140_vm1 = vweird.f32 %v134_v32 }
 0x12c   :  { %v147_v40 = vor.u32 1.1754944e-38, %v146_v36  ;;  %vm145_vm4 = vcmp.eq.f32.partialorder %v144_v38, 8.507059e+37 }
 0x130   :  { %v213_v33 = vpop.eup %212 }
 0x131   :  { %v136_v34 = vmul.f32 %v213_v33, %v134_v32  ;;  %vm141_vm0 = vweird.f32 %v213_v33 }
 0x132   :  { %vm142_vm2 = vmor %vm140_vm1, %vm141_vm0 }
 0x133   :  { %v137_v35 = vsub.f32 1.0, %v136_v34 }
 0x135   :  { %v138_v37 = vmul.f32 %v213_v33, %v137_v35 }
 0x137   :  { %v139_v39 = vadd.f32 %v213_v33, %v138_v37 }
 0x139   :  { %v143_v41 = vsel %vm142_vm2, %v213_v33, %v139_v39 }
 0x13a   :  { %v148_v42 = vsel %vm145_vm4, %v147_v40, %v143_v41 }
 0x13b   :  { %151 = vst.msk [vmem:[#allocation2] sm:$0xf] %vm150_vm3, %v148_v42 }
 0x13c   :  { %162 = dma.vmem_to_hbm [thread:$0]  %s158_s2, 64, %s160_s9, [#allocation3]  }
 0x13d   :  { %238 = dma.done.wait [#allocation3], 64  }
 0x13e   :  { %239 = vsyncadd [#allocation3], 4294967232 }
 0x13f   :  { %167 = vsyncpa [#allocation3], 1 }

</bundles_post_ra>
